<compile_context>
chip_gen: v6e
topology: v6e:2x2x1
jax: 0.10.0
libtpu: 0.0.40
codegen_flags: <defaults>
</compile_context>

<pallas_src>
import math

import jax
import jax.numpy as jnp
from jax.experimental import pallas as pl
from jax.experimental.pallas import tpu as pltpu


_NCOEF = 8  # [c1, c2, (1-ga), c3, c4, vth, vth_prev, pad] per timestep


def _lif_kernel(coef_ref, x_ref, out_ref, u_ref):
    """One (T_CHUNK, TM, 128) tile of the layer-wise gated LIF recurrence."""
    tb = pl.program_id(1)            # T-chunk index (inner, sequential axis)
    t_chunk = x_ref.shape[0]         # static chunk length

    @pl.when(tb == 0)
    def _():
        u_ref[...] = jnp.zeros_like(u_ref)

    u = u_ref[...]                   # membrane potential carried across T
    for j in range(t_chunk):         # small static chunk -> fully unrolled
        base = (tb * t_chunk + j) * _NCOEF
        c1 = coef_ref[base + 0]      # 1 - be * (1 - conduct_t)
        c2 = coef_ref[base + 1]      # 1 - al * (1 - tau)
        g1 = coef_ref[base + 2]      # 1 - ga
        c3 = coef_ref[base + 3]      # (1 - al) * leak
        c4 = coef_ref[base + 4]      # (1 - ga) * reVth
        vth = coef_ref[base + 5]
        vth_prev = coef_ref[base + 6]  # Vth of step t-1 (+inf at t == 0)

        # Previous spike recomputed from the carried membrane potential —
        # no spike scratch and no extra vector store per step.
        o_prev = (u - vth_prev) > 0.0

        x_t = x_ref[j].astype(jnp.float32)
        i_t = x_t * c1
        # Same fp association as the reference formula; o_prev in {0,1}
        # expressed as selects on the precomputed scalar coefficients.
        ud = (c2 * u) * jnp.where(o_prev, g1, 1.0)
        u = ((ud - c3) + i_t) - jnp.where(o_prev, c4, 0.0)

        out_ref[j] = ((u - vth) > 0.0).astype(out_ref.dtype)

    u_ref[...] = u


def _round_up(v, m):
    return -(-v // m) * m


def _choose_tiling(m_raw, T, x_itemsize, out_itemsize, *,
                   tm_target=2048, vmem_budget=16 * 1024 * 1024,
                   min_outer_tiles=2):
    """Pick (TM, M_padded, T_CHUNK) for the (M//TM, T//T_CHUNK) grid."""
    # Sublane alignment so the second-minor block dim is a full native tile
    # for every dtype involved (f32 -> 8, bf16 -> 16, int8 -> 32).
    align = max(8 * 4 // min(x_itemsize, 4), 8 * 4 // min(out_itemsize, 4), 8)
    m_al = _round_up(max(m_raw, 1), align)
    tm = min(_round_up(tm_target, align), m_al)
    # v7x megacore: prefer >= 2 tiles on the outer "parallel" axis when the
    # array is big enough, even if that halves TM.
    if m_al // tm < min_outer_tiles and m_al >= min_outer_tiles * align:
        tm = _round_up(-(-m_al // min_outer_tiles), align)
    m_pad = _round_up(m_al, tm)
    # Largest divisor of T whose pipelined footprint fits the budget:
    # 2x x-buffers + 2x out-buffers per chunk step + the f32 u carry scratch.
    per_step = tm * 128 * 2 * (x_itemsize + out_itemsize)
    u_bytes = tm * 128 * 4
    t_chunk = 1
    for cand in range(T, 0, -1):
        if T % cand == 0 and cand * per_step + u_bytes <= vmem_budget:
            t_chunk = cand
            break
    return tm, m_pad, t_chunk


def lif_spike_pallas(x, params, *, out_dtype=jnp.bfloat16, tm_target=2048):
    """x: [T, ...spatial] float32 or bfloat16; params: [T, 8] float32 (already
    sigmoided): columns = [tau, Vth, leak, conduct, reVth, alpha, beta, gamma].
    Returns spikes in `out_dtype` (0.0/1.0 exact; bf16 default halves HBM
    writeback — pass jnp.float32 if a downstream op needs f32)."""
    T = x.shape[0]
    per_step = math.prod(x.shape[1:])
    x_itemsize = jnp.dtype(x.dtype).itemsize
    out_itemsize = jnp.dtype(out_dtype).itemsize
    m_raw = -(-per_step // 128)
    TM, M, T_CHUNK = _choose_tiling(m_raw, T, x_itemsize, out_itemsize,
                                    tm_target=tm_target)

    # ---- per-step scalar coefficients (cheap glue; flat 1-D SMEM table) -----
    params = params.astype(jnp.float32)
    tau, vth, leak, conduct, revth, al, be, ga = [params[:, k] for k in range(8)]
    c1 = 1.0 - be * (1.0 - conduct)
    c2 = 1.0 - al * (1.0 - tau)
    g1 = 1.0 - ga
    c3 = (1.0 - al) * leak
    c4 = g1 * revth
    # Vth of the previous step; +inf at t == 0 so the recomputed previous spike
    # is exactly 0 there regardless of sign(Vth) (matches the o = 0 init).
    vth_prev = jnp.concatenate(
        [jnp.full((1,), jnp.inf, jnp.float32), vth[:-1]])
    pad_col = jnp.zeros_like(vth)
    coeffs = jnp.stack([c1, c2, g1, c3, c4, vth, vth_prev, pad_col], axis=-1)
    coeffs = coeffs.reshape(T * _NCOEF).astype(jnp.float32)

    # ---- flatten + pad the spatial axis to M * 128 lanes --------------------
    x_flat = x.reshape(T, per_step)
    pad = M * 128 - per_step
    if pad:
        x_flat = jnp.pad(x_flat, ((0, 0), (0, pad)))
    x_flat = x_flat.reshape(T, M, 128)

    cost = pl.CostEstimate(
        flops=10 * T * M * 128,
        transcendentals=0,
        bytes_accessed=T * M * 128 * (x_itemsize + out_itemsize),
    )

    out_flat = pl.pallas_call(
        _lif_kernel,
        out_shape=jax.ShapeDtypeStruct((T, M, 128), out_dtype),
        grid_spec=pltpu.PrefetchScalarGridSpec(
            num_scalar_prefetch=1,
            # M tiles outer ("parallel", sharded across v7x's 2 TCs);
            # T chunks inner ("arbitrary") carry the recurrence in VMEM scratch.
            grid=(M // TM, T // T_CHUNK),
            in_specs=[
                pl.BlockSpec((T_CHUNK, TM, 128), lambda m, t, p: (t, m, 0)),
            ],
            out_specs=pl.BlockSpec((T_CHUNK, TM, 128), lambda m, t, p: (t, m, 0)),
            scratch_shapes=[
                pltpu.VMEM((TM, 128), jnp.float32),   # membrane potential carry
            ],
        ),
        compiler_params=pltpu.CompilerParams(
            dimension_semantics=("parallel", "arbitrary"),
            vmem_limit_bytes=32 * 1024 * 1024,
        ),
        cost_estimate=cost,
    )(coeffs, x_flat)

    out = out_flat.reshape(T, M * 128)
    if pad:
        out = out[:, :per_step]
    return out.reshape(x.shape)


def make_lif_params(T, gate=(0.6, 0.7, 0.8), param=(0.25, 0.5, 0.1, 0.5)):
    """Deterministic parameter init mirroring LIFSpike.__init__
    (static_gate=False, static_param=False, time_wise=False); sigmoids applied."""
    alpha, beta, gamma = [math.log(1.0 / ((g - 0.5) * 0.5 + 0.5) - 1.0) for g in gate]
    al, be, ga = [1.0 / (1.0 + math.exp(-v)) for v in (alpha, beta, gamma)]

    tau_raw, vth_raw, leak_raw = [-math.log(1.0 / p - 1.0) for p in param[:3]]
    revth_raw = -math.log(1.0 / param[1] - 1.0)
    conduct_raw = -math.log(1.0 / param[3] - 1.0) * jnp.ones((T,), jnp.float32)

    sig = jax.nn.sigmoid
    tau_s = sig(jnp.float32(tau_raw))
    vth_s = sig(jnp.float32(vth_raw))
    leak_s = sig(jnp.float32(leak_raw))
    revth_s = sig(jnp.float32(revth_raw))
    conduct_s = sig(conduct_raw)                     # (T,)

    ones_t = jnp.ones((T,), jnp.float32)
    params = jnp.stack(
        [tau_s * ones_t, vth_s * ones_t, leak_s * ones_t, conduct_s,
         revth_s * ones_t, al * ones_t, be * ones_t, ga * ones_t],
        axis=-1,
    ).astype(jnp.float32)                            # (T, 8)
    return params


def lif_spike_ref(x, params):
    """Pure-JAX reference — direct transcription of the PyTorch forward."""
    T = x.shape[0]
    u = jnp.zeros(x.shape[1:], jnp.float32)
    o = jnp.zeros(x.shape[1:], jnp.float32)
    outs = []
    for t in range(T):
        tau, vth, leak, conduct, re_vth, al, be, ga = [params[t, k] for k in range(8)]
        i_t1 = x[t] * (1.0 - be * (1.0 - conduct))
        u = ((1.0 - al * (1.0 - tau)) * u * (1.0 - ga * o)
             - (1.0 - al) * leak + i_t1 - (1.0 - ga) * re_vth * o)
        o = (u - vth > 0.0).astype(jnp.float32)
        outs.append(o)
    return jnp.stack(outs)


if __name__ == "__main__":
    T, B, C, H, W = 8, 2, 4, 16, 16
    key = jax.random.PRNGKey(0)
    x = jax.random.normal(key, (T, B, C, H, W), dtype=jnp.float32)

    params = make_lif_params(T)

    out = jax.block_until_ready(lif_spike_pallas(x, params))
    ref = lif_spike_ref(x, params)

    assert out.shape == x.shape
    mismatch = float(jnp.mean(jnp.not_equal(out.astype(jnp.float32), ref)))
    assert mismatch == 0.0, f"mismatch fraction vs reference: {mismatch}"

    print("KERNEL_OK")
</pallas_src>

<mosaic_0001>
module attributes {stable_mosaic.version = 11 : i64} {
  func.func @_lif_kernel(%arg0: i32, %arg1: i32, %arg2: memref<64xf32, #tpu.memory_space<smem>>, %arg3: memref<8x16x128xf32, #tpu.memory_space<vmem>>, %arg4: memref<8x16x128xbf16, #tpu.memory_space<vmem>>, %arg5: memref<16x128xf32, #tpu.memory_space<vmem>>) attributes {dimension_semantics = [#tpu.dimension_semantics<parallel>, #tpu.dimension_semantics<arbitrary>], iteration_bounds = array<i64: 1, 1>, scalar_prefetch = 1 : i64, scratch_operands = 1 : i64, tpu.core_type = #tpu.core_type<tc>, window_params = [{transform_indices = @transform_0, window_bounds = array<i64: 8, 16, 128>}, {transform_indices = @transform_1, window_bounds = array<i64: 8, 16, 128>}]} {
    %c0_i32 = arith.constant 0 : i32
    %0 = arith.cmpi eq, %arg1, %c0_i32 : i32
    %1 = arith.extui %0 : i1 to i32
    %c0_i32_0 = arith.constant 0 : i32
    %2 = arith.cmpi ne, %1, %c0_i32_0 : i32
    scf.if %2 {
      %cst_148 = arith.constant 0.000000e+00 : f32
      %445 = vector.broadcast %cst_148 : f32 to vector<16x128xf32>
      %c0_149 = arith.constant 0 : index
      %c0_150 = arith.constant 0 : index
      %446 = vector.load %arg5[%c0_149, %c0_150] : memref<16x128xf32, #tpu.memory_space<vmem>>, vector<16x128xf32>
      tpu.vector_store %arg5[%c0_149, %c0_150], %445 {strides = array<i32>} : memref<16x128xf32, #tpu.memory_space<vmem>>, vector<16x128xf32>,
    } else {
    }
    %c0 = arith.constant 0 : index
    %c0_1 = arith.constant 0 : index
    %3 = vector.load %arg5[%c0, %c0_1] : memref<16x128xf32, #tpu.memory_space<vmem>>, vector<16x128xf32>
    %c8_i32 = arith.constant 8 : i32
    %4 = arith.muli %arg1, %c8_i32 : i32
    %c0_i32_2 = arith.constant 0 : i32
    %5 = arith.addi %4, %c0_i32_2 : i32
    %c8_i32_3 = arith.constant 8 : i32
    %6 = arith.muli %5, %c8_i32_3 : i32
    %c0_i32_4 = arith.constant 0 : i32
    %7 = arith.addi %6, %c0_i32_4 : i32
    %8 = arith.index_cast %7 : i32 to index
    %9 = memref.load %arg2[%8] : memref<64xf32, #tpu.memory_space<smem>>
    %c1_i32 = arith.constant 1 : i32
    %10 = arith.addi %6, %c1_i32 : i32
    %11 = arith.index_cast %10 : i32 to index
    %12 = memref.load %arg2[%11] : memref<64xf32, #tpu.memory_space<smem>>
    %c2_i32 = arith.constant 2 : i32
    %13 = arith.addi %6, %c2_i32 : i32
    %14 = arith.index_cast %13 : i32 to index
    %15 = memref.load %arg2[%14] : memref<64xf32, #tpu.memory_space<smem>>
    %c3_i32 = arith.constant 3 : i32
    %16 = arith.addi %6, %c3_i32 : i32
    %17 = arith.index_cast %16 : i32 to index
    %18 = memref.load %arg2[%17] : memref<64xf32, #tpu.memory_space<smem>>
    %c4_i32 = arith.constant 4 : i32
    %19 = arith.addi %6, %c4_i32 : i32
    %20 = arith.index_cast %19 : i32 to index
    %21 = memref.load %arg2[%20] : memref<64xf32, #tpu.memory_space<smem>>
    %c5_i32 = arith.constant 5 : i32
    %22 = arith.addi %6, %c5_i32 : i32
    %23 = arith.index_cast %22 : i32 to index
    %24 = memref.load %arg2[%23] : memref<64xf32, #tpu.memory_space<smem>>
    %c6_i32 = arith.constant 6 : i32
    %25 = arith.addi %6, %c6_i32 : i32
    %26 = arith.index_cast %25 : i32 to index
    %27 = memref.load %arg2[%26] : memref<64xf32, #tpu.memory_space<smem>>
    %28 = vector.broadcast %27 : f32 to vector<16x128xf32>
    %29 = arith.subf %3, %28 : vector<16x128xf32>
    %cst = arith.constant 0.000000e+00 : f32
    %30 = vector.broadcast %cst : f32 to vector<16x128xf32>
    %31 = arith.cmpf ogt, %29, %30 : vector<16x128xf32>
    %c0_5 = arith.constant 0 : index
    %c0_6 = arith.constant 0 : index
    %c0_7 = arith.constant 0 : index
    %32 = vector.load %arg3[%c0_5, %c0_6, %c0_7] : memref<8x16x128xf32, #tpu.memory_space<vmem>>, vector<1x16x128xf32>
    %33 = vector.shape_cast %32 : vector<1x16x128xf32> to vector<16x128xf32>
    %34 = vector.broadcast %9 : f32 to vector<16x128xf32>
    %35 = arith.mulf %33, %34 : vector<16x128xf32>
    %36 = vector.broadcast %12 : f32 to vector<16x128xf32>
    %37 = arith.mulf %36, %3 : vector<16x128xf32>
    %cst_8 = arith.constant 1.000000e+00 : f32
    %38 = vector.broadcast %15 : f32 to vector<16x128xf32>
    %39 = vector.broadcast %cst_8 : f32 to vector<16x128xf32>
    %40 = arith.select %31, %38, %39 : vector<16x128xi1>, vector<16x128xf32>
    %41 = arith.mulf %37, %40 : vector<16x128xf32>
    %42 = vector.broadcast %18 : f32 to vector<16x128xf32>
    %43 = arith.subf %41, %42 : vector<16x128xf32>
    %44 = arith.addf %43, %35 : vector<16x128xf32>
    %cst_9 = arith.constant 0.000000e+00 : f32
    %45 = vector.broadcast %21 : f32 to vector<16x128xf32>
    %46 = vector.broadcast %cst_9 : f32 to vector<16x128xf32>
    %47 = arith.select %31, %45, %46 : vector<16x128xi1>, vector<16x128xf32>
    %48 = arith.subf %44, %47 : vector<16x128xf32>
    %49 = vector.broadcast %24 : f32 to vector<16x128xf32>
    %50 = arith.subf %48, %49 : vector<16x128xf32>
    %cst_10 = arith.constant 0.000000e+00 : f32
    %51 = vector.broadcast %cst_10 : f32 to vector<16x128xf32>
    %52 = arith.cmpf ogt, %50, %51 : vector<16x128xf32>
    %53 = arith.extui %52 : vector<16x128xi1> to vector<16x128xi32>
    %54 = arith.sitofp %53 : vector<16x128xi32> to vector<16x128xf32>
    %55 = arith.truncf %54 : vector<16x128xf32> to vector<16x128xbf16>
    %c0_11 = arith.constant 0 : index
    %c0_12 = arith.constant 0 : index
    %c0_13 = arith.constant 0 : index
    %56 = vector.load %arg4[%c0_11, %c0_12, %c0_13] : memref<8x16x128xbf16, #tpu.memory_space<vmem>>, vector<1x16x128xbf16>
    %57 = vector.shape_cast %56 : vector<1x16x128xbf16> to vector<16x128xbf16>
    %58 = vector.shape_cast %55 : vector<16x128xbf16> to vector<1x16x128xbf16>
    tpu.vector_store %arg4[%c0_11, %c0_12, %c0_13], %58 {strides = array<i32>} : memref<8x16x128xbf16, #tpu.memory_space<vmem>>, vector<1x16x128xbf16>,
    %c8_i32_14 = arith.constant 8 : i32
    %59 = arith.muli %arg1, %c8_i32_14 : i32
    %c1_i32_15 = arith.constant 1 : i32
    %60 = arith.addi %59, %c1_i32_15 : i32
    %c8_i32_16 = arith.constant 8 : i32
    %61 = arith.muli %60, %c8_i32_16 : i32
    %c0_i32_17 = arith.constant 0 : i32
    %62 = arith.addi %61, %c0_i32_17 : i32
    %63 = arith.index_cast %62 : i32 to index
    %64 = memref.load %arg2[%63] : memref<64xf32, #tpu.memory_space<smem>>
    %c1_i32_18 = arith.constant 1 : i32
    %65 = arith.addi %61, %c1_i32_18 : i32
    %66 = arith.index_cast %65 : i32 to index
    %67 = memref.load %arg2[%66] : memref<64xf32, #tpu.memory_space<smem>>
    %c2_i32_19 = arith.constant 2 : i32
    %68 = arith.addi %61, %c2_i32_19 : i32
    %69 = arith.index_cast %68 : i32 to index
    %70 = memref.load %arg2[%69] : memref<64xf32, #tpu.memory_space<smem>>
    %c3_i32_20 = arith.constant 3 : i32
    %71 = arith.addi %61, %c3_i32_20 : i32
    %72 = arith.index_cast %71 : i32 to index
    %73 = memref.load %arg2[%72] : memref<64xf32, #tpu.memory_space<smem>>
    %c4_i32_21 = arith.constant 4 : i32
    %74 = arith.addi %61, %c4_i32_21 : i32
    %75 = arith.index_cast %74 : i32 to index
    %76 = memref.load %arg2[%75] : memref<64xf32, #tpu.memory_space<smem>>
    %c5_i32_22 = arith.constant 5 : i32
    %77 = arith.addi %61, %c5_i32_22 : i32
    %78 = arith.index_cast %77 : i32 to index
    %79 = memref.load %arg2[%78] : memref<64xf32, #tpu.memory_space<smem>>
    %c6_i32_23 = arith.constant 6 : i32
    %80 = arith.addi %61, %c6_i32_23 : i32
    %81 = arith.index_cast %80 : i32 to index
    %82 = memref.load %arg2[%81] : memref<64xf32, #tpu.memory_space<smem>>
    %83 = vector.broadcast %82 : f32 to vector<16x128xf32>
    %84 = arith.subf %48, %83 : vector<16x128xf32>
    %cst_24 = arith.constant 0.000000e+00 : f32
    %85 = vector.broadcast %cst_24 : f32 to vector<16x128xf32>
    %86 = arith.cmpf ogt, %84, %85 : vector<16x128xf32>
    %c1 = arith.constant 1 : index
    %c0_25 = arith.constant 0 : index
    %c0_26 = arith.constant 0 : index
    %87 = vector.load %arg3[%c1, %c0_25, %c0_26] : memref<8x16x128xf32, #tpu.memory_space<vmem>>, vector<1x16x128xf32>
    %88 = vector.shape_cast %87 : vector<1x16x128xf32> to vector<16x128xf32>
    %89 = vector.broadcast %64 : f32 to vector<16x128xf32>
    %90 = arith.mulf %88, %89 : vector<16x128xf32>
    %91 = vector.broadcast %67 : f32 to vector<16x128xf32>
    %92 = arith.mulf %91, %48 : vector<16x128xf32>
    %cst_27 = arith.constant 1.000000e+00 : f32
    %93 = vector.broadcast %70 : f32 to vector<16x128xf32>
    %94 = vector.broadcast %cst_27 : f32 to vector<16x128xf32>
    %95 = arith.select %86, %93, %94 : vector<16x128xi1>, vector<16x128xf32>
    %96 = arith.mulf %92, %95 : vector<16x128xf32>
    %97 = vector.broadcast %73 : f32 to vector<16x128xf32>
    %98 = arith.subf %96, %97 : vector<16x128xf32>
    %99 = arith.addf %98, %90 : vector<16x128xf32>
    %cst_28 = arith.constant 0.000000e+00 : f32
    %100 = vector.broadcast %76 : f32 to vector<16x128xf32>
    %101 = vector.broadcast %cst_28 : f32 to vector<16x128xf32>
    %102 = arith.select %86, %100, %101 : vector<16x128xi1>, vector<16x128xf32>
    %103 = arith.subf %99, %102 : vector<16x128xf32>
    %104 = vector.broadcast %79 : f32 to vector<16x128xf32>
    %105 = arith.subf %103, %104 : vector<16x128xf32>
    %cst_29 = arith.constant 0.000000e+00 : f32
    %106 = vector.broadcast %cst_29 : f32 to vector<16x128xf32>
    %107 = arith.cmpf ogt, %105, %106 : vector<16x128xf32>
    %108 = arith.extui %107 : vector<16x128xi1> to vector<16x128xi32>
    %109 = arith.sitofp %108 : vector<16x128xi32> to vector<16x128xf32>
    %110 = arith.truncf %109 : vector<16x128xf32> to vector<16x128xbf16>
    %c1_30 = arith.constant 1 : index
    %c0_31 = arith.constant 0 : index
    %c0_32 = arith.constant 0 : index
    %111 = vector.load %arg4[%c1_30, %c0_31, %c0_32] : memref<8x16x128xbf16, #tpu.memory_space<vmem>>, vector<1x16x128xbf16>
    %112 = vector.shape_cast %111 : vector<1x16x128xbf16> to vector<16x128xbf16>
    %113 = vector.shape_cast %110 : vector<16x128xbf16> to vector<1x16x128xbf16>
    tpu.vector_store %arg4[%c1_30, %c0_31, %c0_32], %113 {strides = array<i32>} : memref<8x16x128xbf16, #tpu.memory_space<vmem>>, vector<1x16x128xbf16>,
    %c8_i32_33 = arith.constant 8 : i32
    %114 = arith.muli %arg1, %c8_i32_33 : i32
    %c2_i32_34 = arith.constant 2 : i32
    %115 = arith.addi %114, %c2_i32_34 : i32
    %c8_i32_35 = arith.constant 8 : i32
    %116 = arith.muli %115, %c8_i32_35 : i32
    %c0_i32_36 = arith.constant 0 : i32
    %117 = arith.addi %116, %c0_i32_36 : i32
    %118 = arith.index_cast %117 : i32 to index
    %119 = memref.load %arg2[%118] : memref<64xf32, #tpu.memory_space<smem>>
    %c1_i32_37 = arith.constant 1 : i32
    %120 = arith.addi %116, %c1_i32_37 : i32
    %121 = arith.index_cast %120 : i32 to index
    %122 = memref.load %arg2[%121] : memref<64xf32, #tpu.memory_space<smem>>
    %c2_i32_38 = arith.constant 2 : i32
    %123 = arith.addi %116, %c2_i32_38 : i32
    %124 = arith.index_cast %123 : i32 to index
    %125 = memref.load %arg2[%124] : memref<64xf32, #tpu.memory_space<smem>>
    %c3_i32_39 = arith.constant 3 : i32
    %126 = arith.addi %116, %c3_i32_39 : i32
    %127 = arith.index_cast %126 : i32 to index
    %128 = memref.load %arg2[%127] : memref<64xf32, #tpu.memory_space<smem>>
    %c4_i32_40 = arith.constant 4 : i32
    %129 = arith.addi %116, %c4_i32_40 : i32
    %130 = arith.index_cast %129 : i32 to index
    %131 = memref.load %arg2[%130] : memref<64xf32, #tpu.memory_space<smem>>
    %c5_i32_41 = arith.constant 5 : i32
    %132 = arith.addi %116, %c5_i32_41 : i32
    %133 = arith.index_cast %132 : i32 to index
    %134 = memref.load %arg2[%133] : memref<64xf32, #tpu.memory_space<smem>>
    %c6_i32_42 = arith.constant 6 : i32
    %135 = arith.addi %116, %c6_i32_42 : i32
    %136 = arith.index_cast %135 : i32 to index
    %137 = memref.load %arg2[%136] : memref<64xf32, #tpu.memory_space<smem>>
    %138 = vector.broadcast %137 : f32 to vector<16x128xf32>
    %139 = arith.subf %103, %138 : vector<16x128xf32>
    %cst_43 = arith.constant 0.000000e+00 : f32
    %140 = vector.broadcast %cst_43 : f32 to vector<16x128xf32>
    %141 = arith.cmpf ogt, %139, %140 : vector<16x128xf32>
    %c2 = arith.constant 2 : index
    %c0_44 = arith.constant 0 : index
    %c0_45 = arith.constant 0 : index
    %142 = vector.load %arg3[%c2, %c0_44, %c0_45] : memref<8x16x128xf32, #tpu.memory_space<vmem>>, vector<1x16x128xf32>
    %143 = vector.shape_cast %142 : vector<1x16x128xf32> to vector<16x128xf32>
    %144 = vector.broadcast %119 : f32 to vector<16x128xf32>
    %145 = arith.mulf %143, %144 : vector<16x128xf32>
    %146 = vector.broadcast %122 : f32 to vector<16x128xf32>
    %147 = arith.mulf %146, %103 : vector<16x128xf32>
    %cst_46 = arith.constant 1.000000e+00 : f32
    %148 = vector.broadcast %125 : f32 to vector<16x128xf32>
    %149 = vector.broadcast %cst_46 : f32 to vector<16x128xf32>
    %150 = arith.select %141, %148, %149 : vector<16x128xi1>, vector<16x128xf32>
    %151 = arith.mulf %147, %150 : vector<16x128xf32>
    %152 = vector.broadcast %128 : f32 to vector<16x128xf32>
    %153 = arith.subf %151, %152 : vector<16x128xf32>
    %154 = arith.addf %153, %145 : vector<16x128xf32>
    %cst_47 = arith.constant 0.000000e+00 : f32
    %155 = vector.broadcast %131 : f32 to vector<16x128xf32>
    %156 = vector.broadcast %cst_47 : f32 to vector<16x128xf32>
    %157 = arith.select %141, %155, %156 : vector<16x128xi1>, vector<16x128xf32>
    %158 = arith.subf %154, %157 : vector<16x128xf32>
    %159 = vector.broadcast %134 : f32 to vector<16x128xf32>
    %160 = arith.subf %158, %159 : vector<16x128xf32>
    %cst_48 = arith.constant 0.000000e+00 : f32
    %161 = vector.broadcast %cst_48 : f32 to vector<16x128xf32>
    %162 = arith.cmpf ogt, %160, %161 : vector<16x128xf32>
    %163 = arith.extui %162 : vector<16x128xi1> to vector<16x128xi32>
    %164 = arith.sitofp %163 : vector<16x128xi32> to vector<16x128xf32>
    %165 = arith.truncf %164 : vector<16x128xf32> to vector<16x128xbf16>
    %c2_49 = arith.constant 2 : index
    %c0_50 = arith.constant 0 : index
    %c0_51 = arith.constant 0 : index
    %166 = vector.load %arg4[%c2_49, %c0_50, %c0_51] : memref<8x16x128xbf16, #tpu.memory_space<vmem>>, vector<1x16x128xbf16>
    %167 = vector.shape_cast %166 : vector<1x16x128xbf16> to vector<16x128xbf16>
    %168 = vector.shape_cast %165 : vector<16x128xbf16> to vector<1x16x128xbf16>
    tpu.vector_store %arg4[%c2_49, %c0_50, %c0_51], %168 {strides = array<i32>} : memref<8x16x128xbf16, #tpu.memory_space<vmem>>, vector<1x16x128xbf16>,
    %c8_i32_52 = arith.constant 8 : i32
    %169 = arith.muli %arg1, %c8_i32_52 : i32
    %c3_i32_53 = arith.constant 3 : i32
    %170 = arith.addi %169, %c3_i32_53 : i32
    %c8_i32_54 = arith.constant 8 : i32
    %171 = arith.muli %170, %c8_i32_54 : i32
    %c0_i32_55 = arith.constant 0 : i32
    %172 = arith.addi %171, %c0_i32_55 : i32
    %173 = arith.index_cast %172 : i32 to index
    %174 = memref.load %arg2[%173] : memref<64xf32, #tpu.memory_space<smem>>
    %c1_i32_56 = arith.constant 1 : i32
    %175 = arith.addi %171, %c1_i32_56 : i32
    %176 = arith.index_cast %175 : i32 to index
    %177 = memref.load %arg2[%176] : memref<64xf32, #tpu.memory_space<smem>>
    %c2_i32_57 = arith.constant 2 : i32
    %178 = arith.addi %171, %c2_i32_57 : i32
    %179 = arith.index_cast %178 : i32 to index
    %180 = memref.load %arg2[%179] : memref<64xf32, #tpu.memory_space<smem>>
    %c3_i32_58 = arith.constant 3 : i32
    %181 = arith.addi %171, %c3_i32_58 : i32
    %182 = arith.index_cast %181 : i32 to index
    %183 = memref.load %arg2[%182] : memref<64xf32, #tpu.memory_space<smem>>
    %c4_i32_59 = arith.constant 4 : i32
    %184 = arith.addi %171, %c4_i32_59 : i32
    %185 = arith.index_cast %184 : i32 to index
    %186 = memref.load %arg2[%185] : memref<64xf32, #tpu.memory_space<smem>>
    %c5_i32_60 = arith.constant 5 : i32
    %187 = arith.addi %171, %c5_i32_60 : i32
    %188 = arith.index_cast %187 : i32 to index
    %189 = memref.load %arg2[%188] : memref<64xf32, #tpu.memory_space<smem>>
    %c6_i32_61 = arith.constant 6 : i32
    %190 = arith.addi %171, %c6_i32_61 : i32
    %191 = arith.index_cast %190 : i32 to index
    %192 = memref.load %arg2[%191] : memref<64xf32, #tpu.memory_space<smem>>
    %193 = vector.broadcast %192 : f32 to vector<16x128xf32>
    %194 = arith.subf %158, %193 : vector<16x128xf32>
    %cst_62 = arith.constant 0.000000e+00 : f32
    %195 = vector.broadcast %cst_62 : f32 to vector<16x128xf32>
    %196 = arith.cmpf ogt, %194, %195 : vector<16x128xf32>
    %c3 = arith.constant 3 : index
    %c0_63 = arith.constant 0 : index
    %c0_64 = arith.constant 0 : index
    %197 = vector.load %arg3[%c3, %c0_63, %c0_64] : memref<8x16x128xf32, #tpu.memory_space<vmem>>, vector<1x16x128xf32>
    %198 = vector.shape_cast %197 : vector<1x16x128xf32> to vector<16x128xf32>
    %199 = vector.broadcast %174 : f32 to vector<16x128xf32>
    %200 = arith.mulf %198, %199 : vector<16x128xf32>
    %201 = vector.broadcast %177 : f32 to vector<16x128xf32>
    %202 = arith.mulf %201, %158 : vector<16x128xf32>
    %cst_65 = arith.constant 1.000000e+00 : f32
    %203 = vector.broadcast %180 : f32 to vector<16x128xf32>
    %204 = vector.broadcast %cst_65 : f32 to vector<16x128xf32>
    %205 = arith.select %196, %203, %204 : vector<16x128xi1>, vector<16x128xf32>
    %206 = arith.mulf %202, %205 : vector<16x128xf32>
    %207 = vector.broadcast %183 : f32 to vector<16x128xf32>
    %208 = arith.subf %206, %207 : vector<16x128xf32>
    %209 = arith.addf %208, %200 : vector<16x128xf32>
    %cst_66 = arith.constant 0.000000e+00 : f32
    %210 = vector.broadcast %186 : f32 to vector<16x128xf32>
    %211 = vector.broadcast %cst_66 : f32 to vector<16x128xf32>
    %212 = arith.select %196, %210, %211 : vector<16x128xi1>, vector<16x128xf32>
    %213 = arith.subf %209, %212 : vector<16x128xf32>
    %214 = vector.broadcast %189 : f32 to vector<16x128xf32>
    %215 = arith.subf %213, %214 : vector<16x128xf32>
    %cst_67 = arith.constant 0.000000e+00 : f32
    %216 = vector.broadcast %cst_67 : f32 to vector<16x128xf32>
    %217 = arith.cmpf ogt, %215, %216 : vector<16x128xf32>
    %218 = arith.extui %217 : vector<16x128xi1> to vector<16x128xi32>
    %219 = arith.sitofp %218 : vector<16x128xi32> to vector<16x128xf32>
    %220 = arith.truncf %219 : vector<16x128xf32> to vector<16x128xbf16>
    %c3_68 = arith.constant 3 : index
    %c0_69 = arith.constant 0 : index
    %c0_70 = arith.constant 0 : index
    %221 = vector.load %arg4[%c3_68, %c0_69, %c0_70] : memref<8x16x128xbf16, #tpu.memory_space<vmem>>, vector<1x16x128xbf16>
    %222 = vector.shape_cast %221 : vector<1x16x128xbf16> to vector<16x128xbf16>
    %223 = vector.shape_cast %220 : vector<16x128xbf16> to vector<1x16x128xbf16>
    tpu.vector_store %arg4[%c3_68, %c0_69, %c0_70], %223 {strides = array<i32>} : memref<8x16x128xbf16, #tpu.memory_space<vmem>>, vector<1x16x128xbf16>,
    %c8_i32_71 = arith.constant 8 : i32
    %224 = arith.muli %arg1, %c8_i32_71 : i32
    %c4_i32_72 = arith.constant 4 : i32
    %225 = arith.addi %224, %c4_i32_72 : i32
    %c8_i32_73 = arith.constant 8 : i32
    %226 = arith.muli %225, %c8_i32_73 : i32
    %c0_i32_74 = arith.constant 0 : i32
    %227 = arith.addi %226, %c0_i32_74 : i32
    %228 = arith.index_cast %227 : i32 to index
    %229 = memref.load %arg2[%228] : memref<64xf32, #tpu.memory_space<smem>>
    %c1_i32_75 = arith.constant 1 : i32
    %230 = arith.addi %226, %c1_i32_75 : i32
    %231 = arith.index_cast %230 : i32 to index
    %232 = memref.load %arg2[%231] : memref<64xf32, #tpu.memory_space<smem>>
    %c2_i32_76 = arith.constant 2 : i32
    %233 = arith.addi %226, %c2_i32_76 : i32
    %234 = arith.index_cast %233 : i32 to index
    %235 = memref.load %arg2[%234] : memref<64xf32, #tpu.memory_space<smem>>
    %c3_i32_77 = arith.constant 3 : i32
    %236 = arith.addi %226, %c3_i32_77 : i32
    %237 = arith.index_cast %236 : i32 to index
    %238 = memref.load %arg2[%237] : memref<64xf32, #tpu.memory_space<smem>>
    %c4_i32_78 = arith.constant 4 : i32
    %239 = arith.addi %226, %c4_i32_78 : i32
    %240 = arith.index_cast %239 : i32 to index
    %241 = memref.load %arg2[%240] : memref<64xf32, #tpu.memory_space<smem>>
    %c5_i32_79 = arith.constant 5 : i32
    %242 = arith.addi %226, %c5_i32_79 : i32
    %243 = arith.index_cast %242 : i32 to index
    %244 = memref.load %arg2[%243] : memref<64xf32, #tpu.memory_space<smem>>
    %c6_i32_80 = arith.constant 6 : i32
    %245 = arith.addi %226, %c6_i32_80 : i32
    %246 = arith.index_cast %245 : i32 to index
    %247 = memref.load %arg2[%246] : memref<64xf32, #tpu.memory_space<smem>>
    %248 = vector.broadcast %247 : f32 to vector<16x128xf32>
    %249 = arith.subf %213, %248 : vector<16x128xf32>
    %cst_81 = arith.constant 0.000000e+00 : f32
    %250 = vector.broadcast %cst_81 : f32 to vector<16x128xf32>
    %251 = arith.cmpf ogt, %249, %250 : vector<16x128xf32>
    %c4 = arith.constant 4 : index
    %c0_82 = arith.constant 0 : index
    %c0_83 = arith.constant 0 : index
    %252 = vector.load %arg3[%c4, %c0_82, %c0_83] : memref<8x16x128xf32, #tpu.memory_space<vmem>>, vector<1x16x128xf32>
    %253 = vector.shape_cast %252 : vector<1x16x128xf32> to vector<16x128xf32>
    %254 = vector.broadcast %229 : f32 to vector<16x128xf32>
    %255 = arith.mulf %253, %254 : vector<16x128xf32>
    %256 = vector.broadcast %232 : f32 to vector<16x128xf32>
    %257 = arith.mulf %256, %213 : vector<16x128xf32>
    %cst_84 = arith.constant 1.000000e+00 : f32
    %258 = vector.broadcast %235 : f32 to vector<16x128xf32>
    %259 = vector.broadcast %cst_84 : f32 to vector<16x128xf32>
    %260 = arith.select %251, %258, %259 : vector<16x128xi1>, vector<16x128xf32>
    %261 = arith.mulf %257, %260 : vector<16x128xf32>
    %262 = vector.broadcast %238 : f32 to vector<16x128xf32>
    %263 = arith.subf %261, %262 : vector<16x128xf32>
    %264 = arith.addf %263, %255 : vector<16x128xf32>
    %cst_85 = arith.constant 0.000000e+00 : f32
    %265 = vector.broadcast %241 : f32 to vector<16x128xf32>
    %266 = vector.broadcast %cst_85 : f32 to vector<16x128xf32>
    %267 = arith.select %251, %265, %266 : vector<16x128xi1>, vector<16x128xf32>
    %268 = arith.subf %264, %267 : vector<16x128xf32>
    %269 = vector.broadcast %244 : f32 to vector<16x128xf32>
    %270 = arith.subf %268, %269 : vector<16x128xf32>
    %cst_86 = arith.constant 0.000000e+00 : f32
    %271 = vector.broadcast %cst_86 : f32 to vector<16x128xf32>
    %272 = arith.cmpf ogt, %270, %271 : vector<16x128xf32>
    %273 = arith.extui %272 : vector<16x128xi1> to vector<16x128xi32>
    %274 = arith.sitofp %273 : vector<16x128xi32> to vector<16x128xf32>
    %275 = arith.truncf %274 : vector<16x128xf32> to vector<16x128xbf16>
    %c4_87 = arith.constant 4 : index
    %c0_88 = arith.constant 0 : index
    %c0_89 = arith.constant 0 : index
    %276 = vector.load %arg4[%c4_87, %c0_88, %c0_89] : memref<8x16x128xbf16, #tpu.memory_space<vmem>>, vector<1x16x128xbf16>
    %277 = vector.shape_cast %276 : vector<1x16x128xbf16> to vector<16x128xbf16>
    %278 = vector.shape_cast %275 : vector<16x128xbf16> to vector<1x16x128xbf16>
    tpu.vector_store %arg4[%c4_87, %c0_88, %c0_89], %278 {strides = array<i32>} : memref<8x16x128xbf16, #tpu.memory_space<vmem>>, vector<1x16x128xbf16>,
    %c8_i32_90 = arith.constant 8 : i32
    %279 = arith.muli %arg1, %c8_i32_90 : i32
    %c5_i32_91 = arith.constant 5 : i32
    %280 = arith.addi %279, %c5_i32_91 : i32
    %c8_i32_92 = arith.constant 8 : i32
    %281 = arith.muli %280, %c8_i32_92 : i32
    %c0_i32_93 = arith.constant 0 : i32
    %282 = arith.addi %281, %c0_i32_93 : i32
    %283 = arith.index_cast %282 : i32 to index
    %284 = memref.load %arg2[%283] : memref<64xf32, #tpu.memory_space<smem>>
    %c1_i32_94 = arith.constant 1 : i32
    %285 = arith.addi %281, %c1_i32_94 : i32
    %286 = arith.index_cast %285 : i32 to index
    %287 = memref.load %arg2[%286] : memref<64xf32, #tpu.memory_space<smem>>
    %c2_i32_95 = arith.constant 2 : i32
    %288 = arith.addi %281, %c2_i32_95 : i32
    %289 = arith.index_cast %288 : i32 to index
    %290 = memref.load %arg2[%289] : memref<64xf32, #tpu.memory_space<smem>>
    %c3_i32_96 = arith.constant 3 : i32
    %291 = arith.addi %281, %c3_i32_96 : i32
    %292 = arith.index_cast %291 : i32 to index
    %293 = memref.load %arg2[%292] : memref<64xf32, #tpu.memory_space<smem>>
    %c4_i32_97 = arith.constant 4 : i32
    %294 = arith.addi %281, %c4_i32_97 : i32
    %295 = arith.index_cast %294 : i32 to index
    %296 = memref.load %arg2[%295] : memref<64xf32, #tpu.memory_space<smem>>
    %c5_i32_98 = arith.constant 5 : i32
    %297 = arith.addi %281, %c5_i32_98 : i32
    %298 = arith.index_cast %297 : i32 to index
    %299 = memref.load %arg2[%298] : memref<64xf32, #tpu.memory_space<smem>>
    %c6_i32_99 = arith.constant 6 : i32
    %300 = arith.addi %281, %c6_i32_99 : i32
    %301 = arith.index_cast %300 : i32 to index
    %302 = memref.load %arg2[%301] : memref<64xf32, #tpu.memory_space<smem>>
    %303 = vector.broadcast %302 : f32 to vector<16x128xf32>
    %304 = arith.subf %268, %303 : vector<16x128xf32>
    %cst_100 = arith.constant 0.000000e+00 : f32
    %305 = vector.broadcast %cst_100 : f32 to vector<16x128xf32>
    %306 = arith.cmpf ogt, %304, %305 : vector<16x128xf32>
    %c5 = arith.constant 5 : index
    %c0_101 = arith.constant 0 : index
    %c0_102 = arith.constant 0 : index
    %307 = vector.load %arg3[%c5, %c0_101, %c0_102] : memref<8x16x128xf32, #tpu.memory_space<vmem>>, vector<1x16x128xf32>
    %308 = vector.shape_cast %307 : vector<1x16x128xf32> to vector<16x128xf32>
    %309 = vector.broadcast %284 : f32 to vector<16x128xf32>
    %310 = arith.mulf %308, %309 : vector<16x128xf32>
    %311 = vector.broadcast %287 : f32 to vector<16x128xf32>
    %312 = arith.mulf %311, %268 : vector<16x128xf32>
    %cst_103 = arith.constant 1.000000e+00 : f32
    %313 = vector.broadcast %290 : f32 to vector<16x128xf32>
    %314 = vector.broadcast %cst_103 : f32 to vector<16x128xf32>
    %315 = arith.select %306, %313, %314 : vector<16x128xi1>, vector<16x128xf32>
    %316 = arith.mulf %312, %315 : vector<16x128xf32>
    %317 = vector.broadcast %293 : f32 to vector<16x128xf32>
    %318 = arith.subf %316, %317 : vector<16x128xf32>
    %319 = arith.addf %318, %310 : vector<16x128xf32>
    %cst_104 = arith.constant 0.000000e+00 : f32
    %320 = vector.broadcast %296 : f32 to vector<16x128xf32>
    %321 = vector.broadcast %cst_104 : f32 to vector<16x128xf32>
    %322 = arith.select %306, %320, %321 : vector<16x128xi1>, vector<16x128xf32>
    %323 = arith.subf %319, %322 : vector<16x128xf32>
    %324 = vector.broadcast %299 : f32 to vector<16x128xf32>
    %325 = arith.subf %323, %324 : vector<16x128xf32>
    %cst_105 = arith.constant 0.000000e+00 : f32
    %326 = vector.broadcast %cst_105 : f32 to vector<16x128xf32>
    %327 = arith.cmpf ogt, %325, %326 : vector<16x128xf32>
    %328 = arith.extui %327 : vector<16x128xi1> to vector<16x128xi32>
    %329 = arith.sitofp %328 : vector<16x128xi32> to vector<16x128xf32>
    %330 = arith.truncf %329 : vector<16x128xf32> to vector<16x128xbf16>
    %c5_106 = arith.constant 5 : index
    %c0_107 = arith.constant 0 : index
    %c0_108 = arith.constant 0 : index
    %331 = vector.load %arg4[%c5_106, %c0_107, %c0_108] : memref<8x16x128xbf16, #tpu.memory_space<vmem>>, vector<1x16x128xbf16>
    %332 = vector.shape_cast %331 : vector<1x16x128xbf16> to vector<16x128xbf16>
    %333 = vector.shape_cast %330 : vector<16x128xbf16> to vector<1x16x128xbf16>
    tpu.vector_store %arg4[%c5_106, %c0_107, %c0_108], %333 {strides = array<i32>} : memref<8x16x128xbf16, #tpu.memory_space<vmem>>, vector<1x16x128xbf16>,
    %c8_i32_109 = arith.constant 8 : i32
    %334 = arith.muli %arg1, %c8_i32_109 : i32
    %c6_i32_110 = arith.constant 6 : i32
    %335 = arith.addi %334, %c6_i32_110 : i32
    %c8_i32_111 = arith.constant 8 : i32
    %336 = arith.muli %335, %c8_i32_111 : i32
    %c0_i32_112 = arith.constant 0 : i32
    %337 = arith.addi %336, %c0_i32_112 : i32
    %338 = arith.index_cast %337 : i32 to index
    %339 = memref.load %arg2[%338] : memref<64xf32, #tpu.memory_space<smem>>
    %c1_i32_113 = arith.constant 1 : i32
    %340 = arith.addi %336, %c1_i32_113 : i32
    %341 = arith.index_cast %340 : i32 to index
    %342 = memref.load %arg2[%341] : memref<64xf32, #tpu.memory_space<smem>>
    %c2_i32_114 = arith.constant 2 : i32
    %343 = arith.addi %336, %c2_i32_114 : i32
    %344 = arith.index_cast %343 : i32 to index
    %345 = memref.load %arg2[%344] : memref<64xf32, #tpu.memory_space<smem>>
    %c3_i32_115 = arith.constant 3 : i32
    %346 = arith.addi %336, %c3_i32_115 : i32
    %347 = arith.index_cast %346 : i32 to index
    %348 = memref.load %arg2[%347] : memref<64xf32, #tpu.memory_space<smem>>
    %c4_i32_116 = arith.constant 4 : i32
    %349 = arith.addi %336, %c4_i32_116 : i32
    %350 = arith.index_cast %349 : i32 to index
    %351 = memref.load %arg2[%350] : memref<64xf32, #tpu.memory_space<smem>>
    %c5_i32_117 = arith.constant 5 : i32
    %352 = arith.addi %336, %c5_i32_117 : i32
    %353 = arith.index_cast %352 : i32 to index
    %354 = memref.load %arg2[%353] : memref<64xf32, #tpu.memory_space<smem>>
    %c6_i32_118 = arith.constant 6 : i32
    %355 = arith.addi %336, %c6_i32_118 : i32
    %356 = arith.index_cast %355 : i32 to index
    %357 = memref.load %arg2[%356] : memref<64xf32, #tpu.memory_space<smem>>
    %358 = vector.broadcast %357 : f32 to vector<16x128xf32>
    %359 = arith.subf %323, %358 : vector<16x128xf32>
    %cst_119 = arith.constant 0.000000e+00 : f32
    %360 = vector.broadcast %cst_119 : f32 to vector<16x128xf32>
    %361 = arith.cmpf ogt, %359, %360 : vector<16x128xf32>
    %c6 = arith.constant 6 : index
    %c0_120 = arith.constant 0 : index
    %c0_121 = arith.constant 0 : index
    %362 = vector.load %arg3[%c6, %c0_120, %c0_121] : memref<8x16x128xf32, #tpu.memory_space<vmem>>, vector<1x16x128xf32>
    %363 = vector.shape_cast %362 : vector<1x16x128xf32> to vector<16x128xf32>
    %364 = vector.broadcast %339 : f32 to vector<16x128xf32>
    %365 = arith.mulf %363, %364 : vector<16x128xf32>
    %366 = vector.broadcast %342 : f32 to vector<16x128xf32>
    %367 = arith.mulf %366, %323 : vector<16x128xf32>
    %cst_122 = arith.constant 1.000000e+00 : f32
    %368 = vector.broadcast %345 : f32 to vector<16x128xf32>
    %369 = vector.broadcast %cst_122 : f32 to vector<16x128xf32>
    %370 = arith.select %361, %368, %369 : vector<16x128xi1>, vector<16x128xf32>
    %371 = arith.mulf %367, %370 : vector<16x128xf32>
    %372 = vector.broadcast %348 : f32 to vector<16x128xf32>
    %373 = arith.subf %371, %372 : vector<16x128xf32>
    %374 = arith.addf %373, %365 : vector<16x128xf32>
    %cst_123 = arith.constant 0.000000e+00 : f32
    %375 = vector.broadcast %351 : f32 to vector<16x128xf32>
    %376 = vector.broadcast %cst_123 : f32 to vector<16x128xf32>
    %377 = arith.select %361, %375, %376 : vector<16x128xi1>, vector<16x128xf32>
    %378 = arith.subf %374, %377 : vector<16x128xf32>
    %379 = vector.broadcast %354 : f32 to vector<16x128xf32>
    %380 = arith.subf %378, %379 : vector<16x128xf32>
    %cst_124 = arith.constant 0.000000e+00 : f32
    %381 = vector.broadcast %cst_124 : f32 to vector<16x128xf32>
    %382 = arith.cmpf ogt, %380, %381 : vector<16x128xf32>
    %383 = arith.extui %382 : vector<16x128xi1> to vector<16x128xi32>
    %384 = arith.sitofp %383 : vector<16x128xi32> to vector<16x128xf32>
    %385 = arith.truncf %384 : vector<16x128xf32> to vector<16x128xbf16>
    %c6_125 = arith.constant 6 : index
    %c0_126 = arith.constant 0 : index
    %c0_127 = arith.constant 0 : index
    %386 = vector.load %arg4[%c6_125, %c0_126, %c0_127] : memref<8x16x128xbf16, #tpu.memory_space<vmem>>, vector<1x16x128xbf16>
    %387 = vector.shape_cast %386 : vector<1x16x128xbf16> to vector<16x128xbf16>
    %388 = vector.shape_cast %385 : vector<16x128xbf16> to vector<1x16x128xbf16>
    tpu.vector_store %arg4[%c6_125, %c0_126, %c0_127], %388 {strides = array<i32>} : memref<8x16x128xbf16, #tpu.memory_space<vmem>>, vector<1x16x128xbf16>,
    %c8_i32_128 = arith.constant 8 : i32
    %389 = arith.muli %arg1, %c8_i32_128 : i32
    %c7_i32 = arith.constant 7 : i32
    %390 = arith.addi %389, %c7_i32 : i32
    %c8_i32_129 = arith.constant 8 : i32
    %391 = arith.muli %390, %c8_i32_129 : i32
    %c0_i32_130 = arith.constant 0 : i32
    %392 = arith.addi %391, %c0_i32_130 : i32
    %393 = arith.index_cast %392 : i32 to index
    %394 = memref.load %arg2[%393] : memref<64xf32, #tpu.memory_space<smem>>
    %c1_i32_131 = arith.constant 1 : i32
    %395 = arith.addi %391, %c1_i32_131 : i32
    %396 = arith.index_cast %395 : i32 to index
    %397 = memref.load %arg2[%396] : memref<64xf32, #tpu.memory_space<smem>>
    %c2_i32_132 = arith.constant 2 : i32
    %398 = arith.addi %391, %c2_i32_132 : i32
    %399 = arith.index_cast %398 : i32 to index
    %400 = memref.load %arg2[%399] : memref<64xf32, #tpu.memory_space<smem>>
    %c3_i32_133 = arith.constant 3 : i32
    %401 = arith.addi %391, %c3_i32_133 : i32
    %402 = arith.index_cast %401 : i32 to index
    %403 = memref.load %arg2[%402] : memref<64xf32, #tpu.memory_space<smem>>
    %c4_i32_134 = arith.constant 4 : i32
    %404 = arith.addi %391, %c4_i32_134 : i32
    %405 = arith.index_cast %404 : i32 to index
    %406 = memref.load %arg2[%405] : memref<64xf32, #tpu.memory_space<smem>>
    %c5_i32_135 = arith.constant 5 : i32
    %407 = arith.addi %391, %c5_i32_135 : i32
    %408 = arith.index_cast %407 : i32 to index
    %409 = memref.load %arg2[%408] : memref<64xf32, #tpu.memory_space<smem>>
    %c6_i32_136 = arith.constant 6 : i32
    %410 = arith.addi %391, %c6_i32_136 : i32
    %411 = arith.index_cast %410 : i32 to index
    %412 = memref.load %arg2[%411] : memref<64xf32, #tpu.memory_space<smem>>
    %413 = vector.broadcast %412 : f32 to vector<16x128xf32>
    %414 = arith.subf %378, %413 : vector<16x128xf32>
    %cst_137 = arith.constant 0.000000e+00 : f32
    %415 = vector.broadcast %cst_137 : f32 to vector<16x128xf32>
    %416 = arith.cmpf ogt, %414, %415 : vector<16x128xf32>
    %c7 = arith.constant 7 : index
    %c0_138 = arith.constant 0 : index
    %c0_139 = arith.constant 0 : index
    %417 = vector.load %arg3[%c7, %c0_138, %c0_139] : memref<8x16x128xf32, #tpu.memory_space<vmem>>, vector<1x16x128xf32>
    %418 = vector.shape_cast %417 : vector<1x16x128xf32> to vector<16x128xf32>
    %419 = vector.broadcast %394 : f32 to vector<16x128xf32>
    %420 = arith.mulf %418, %419 : vector<16x128xf32>
    %421 = vector.broadcast %397 : f32 to vector<16x128xf32>
    %422 = arith.mulf %421, %378 : vector<16x128xf32>
    %cst_140 = arith.constant 1.000000e+00 : f32
    %423 = vector.broadcast %400 : f32 to vector<16x128xf32>
    %424 = vector.broadcast %cst_140 : f32 to vector<16x128xf32>
    %425 = arith.select %416, %423, %424 : vector<16x128xi1>, vector<16x128xf32>
    %426 = arith.mulf %422, %425 : vector<16x128xf32>
    %427 = vector.broadcast %403 : f32 to vector<16x128xf32>
    %428 = arith.subf %426, %427 : vector<16x128xf32>
    %429 = arith.addf %428, %420 : vector<16x128xf32>
    %cst_141 = arith.constant 0.000000e+00 : f32
    %430 = vector.broadcast %406 : f32 to vector<16x128xf32>
    %431 = vector.broadcast %cst_141 : f32 to vector<16x128xf32>
    %432 = arith.select %416, %430, %431 : vector<16x128xi1>, vector<16x128xf32>
    %433 = arith.subf %429, %432 : vector<16x128xf32>
    %434 = vector.broadcast %409 : f32 to vector<16x128xf32>
    %435 = arith.subf %433, %434 : vector<16x128xf32>
    %cst_142 = arith.constant 0.000000e+00 : f32
    %436 = vector.broadcast %cst_142 : f32 to vector<16x128xf32>
    %437 = arith.cmpf ogt, %435, %436 : vector<16x128xf32>
    %438 = arith.extui %437 : vector<16x128xi1> to vector<16x128xi32>
    %439 = arith.sitofp %438 : vector<16x128xi32> to vector<16x128xf32>
    %440 = arith.truncf %439 : vector<16x128xf32> to vector<16x128xbf16>
    %c7_143 = arith.constant 7 : index
    %c0_144 = arith.constant 0 : index
    %c0_145 = arith.constant 0 : index
    %441 = vector.load %arg4[%c7_143, %c0_144, %c0_145] : memref<8x16x128xbf16, #tpu.memory_space<vmem>>, vector<1x16x128xbf16>
    %442 = vector.shape_cast %441 : vector<1x16x128xbf16> to vector<16x128xbf16>
    %443 = vector.shape_cast %440 : vector<16x128xbf16> to vector<1x16x128xbf16>
    tpu.vector_store %arg4[%c7_143, %c0_144, %c0_145], %443 {strides = array<i32>} : memref<8x16x128xbf16, #tpu.memory_space<vmem>>, vector<1x16x128xbf16>,
    %c0_146 = arith.constant 0 : index
    %c0_147 = arith.constant 0 : index
    %444 = vector.load %arg5[%c0_146, %c0_147] : memref<16x128xf32, #tpu.memory_space<vmem>>, vector<16x128xf32>
    tpu.vector_store %arg5[%c0_146, %c0_147], %433 {strides = array<i32>} : memref<16x128xf32, #tpu.memory_space<vmem>>, vector<16x128xf32>,
    return
  }
  func.func @transform_0(%arg0: i32, %arg1: i32, %arg2: memref<64xf32, #tpu.memory_space<smem>>) -> (i32, i32, i32) {
    %c0_i32 = arith.constant 0 : i32
    %c0_i32_0 = arith.constant 0 : i32
    return %arg1, %arg0, %c0_i32 : i32, i32, i32
  }
  func.func @transform_1(%arg0: i32, %arg1: i32, %arg2: memref<64xf32, #tpu.memory_space<smem>>) -> (i32, i32, i32) {
    %c0_i32 = arith.constant 0 : i32
    %c0_i32_0 = arith.constant 0 : i32
    return %arg1, %arg0, %c0_i32 : i32, i32, i32
  }
}

</mosaic_0001>

<bundles_post_ra>
// kernel: tpu_custom_call.1
= control target key start
LH: loop header
LB: loop body
LE: loop exit
PB: predicated region body
PF: predicated region fallthrough
CT: control target
= control target key end

     0   :  { %s754_s9 = smov [#allocation4]   ;;  %s967_s0 = inlined_call_operand.hbm [shape: f32[64], index: 0, kind: input, shape index: {}]   ;;  %s968_s1 = inlined_call_operand.hbm [shape: f32[8,16,128], index: 1, kind: input, shape index: {}]   ;;  %s969_s2 = inlined_call_operand.hbm [shape: bf16[8,16,128], index: 2, kind: output, shape index: {}]  }
   0x1   :  { %8 = dma.hbm_to_smem %s967_s0, 16, %s754_s9, [#allocation3] }
   0x2   :  { %748 = dma.done.wait [#allocation3], 16 }
   0x3   :  { %749 = vsyncadd [#allocation3], 4294967280 }
   0x4   :  { %10 = sfence }
   0x5   :  { %11 = vsyncpa [#allocation6], 0 }
   0x6   :  { %12 = vsyncpa [#allocation7], 0  ;;  %s755_s12 = smov [#allocation5]  }
   0x7   :  { %s18_s13 = sshll.u32 %s755_s12, 4  ;;  %s19_s13 = int_to_ptr.vmem [resolvable:$true] %s18_s13 }
   0x8   :  { %s716_s14 = scalar_lea.vmem %s19_s13, 2048  ;;  %p721_p1 = scmp.lt.s32.totalorder %s19_s13, %s19_s13 }
   0x9   :  { %p717_p0 = scmp.ne.s32.totalorder %s19_s13, %s716_s14  ;;  %p722_p2 = scmp.lt.s32.totalorder %s716_s14, %s716_s14 }
   0xb   :  { %p723_p3 = por %p722_p2, %p721_p1 }
   0xd   :  { %p724_p4 = pnand %p723_p3, %p717_p0 }
   0xf   :  { %727 = shalt.err (!%p724_p4)
}
  0x10   :  { %s756_s15 = smov 128   ;;  %s757_s16 = smov 8  }
  0x11   :  { %24 = dma.hbm_to_vmem [thread:$0]  %s968_s1, 2048, %s19_s13, [#allocation6], %s756_s15, %s756_s15, %s757_s16  }
  0x12   :  { %750 = dma.done.wait [#allocation6], 2048  }
  0x13   :  { %751 = vsyncadd [#allocation6], 4294965248  ;;  %s565_s0 = sld [smem:[#allocation4 + $0x1]]  ;;  %v55_v5 = vld [vmem:[#allocation5] sm:$0xff]  ;;  %v56_v6 = vld [vmem:[#allocation5 + $0x8] sm:$0xff]  ;;  %v758_v34 = vmov 0.0  }
  0x14   :  { %s37_s19 = sld [smem:[#allocation4]]  ;;  %v119_v23 = vld [vmem:[#allocation5 + $0x10] sm:$0xff]  ;;  %v120_v32 = vld [vmem:[#allocation5 + $0x18] sm:$0xff]  ;;  %v183_v56 = vld [vmem:[#allocation5 + $0x20] sm:$0xff] }
  0x15   :  { %s566_s20 = sld [smem:[#allocation4 + $0x2]] }
  0x16   :  { %s570_s21 = sld [smem:[#allocation4 + $0x6]] }
  0x17   :  { %s567_s22 = sld [smem:[#allocation4 + $0x3]] }
  0x18   :  { %s568_s23 = sld [smem:[#allocation4 + $0x4]] }
  0x19   :  { %v60_v0 = vstv %s565_s0  ;;  %s783_s24 = sld [smem:[#allocation4 + $0x5]] }
  0x1a   :  { %v61_v3 = vmul.f32 0.0, %v60_v0  ;;  %v57_v7 = vstv %s37_s19  ;;  %s576_s25 = sld [smem:[#allocation4 + $0x9]] }
  0x1b   :  { %v63_v4 = vstv %s566_s20  ;;  %s581_s1 = sld [smem:[#allocation4 + $0xe]]  ;;  %v58_v10 = vmul.f32 %v57_v7, %v55_v5  ;;  %v59_v11 = vmul.f32 %v57_v7, %v56_v6 }
  0x1c   :  { %v50_v1 = vstv %s570_s21  ;;  %s785_s26 = sld [smem:[#allocation4 + $0x8]] }
  0x1d   :  { %v51_v2 = vsub.f32 0.0, %v50_v1  ;;  %v68_v9 = vstv %s567_s22  ;;  %s787_s27 = sld [smem:[#allocation4 + $0xa]]  ;;  %v184_v1 = vld [vmem:[#allocation5 + $0x28] sm:$0xff] }
  0x1e   :  { %v73_v13 = vstv %s568_s23  ;;  %s789_s28 = sld [smem:[#allocation4 + $0xb]] }
  0x1f   :  { %vm53_vm0 = vcmp.gt.f32.partialorder %v51_v2, 0.0  ;;  %v78_v18 = vstv %s783_s24  ;;  %s792_s29 = sld [smem:[#allocation4 + $0xc]] }
  0x20   :  { %v64_v8 = vsel %vm53_vm0, %v63_v4, 1.0  ;;  %v74_v15 = vsel %vm53_vm0, %v73_v13, 0.0  ;;  %v124_v21 = vstv %s576_s25  ;;  %s796_s30 = sld [smem:[#allocation4 + $0xd]] }
  0x21   :  { %v66_v12 = vmul.f32 %v64_v8, %v61_v3  ;;  %v113_v22 = vstv %s581_s1  ;;  %s798_s3 = sld [smem:[#allocation4 + $0x11]] }
  0x22   :  { %v121_v24 = vstv %s785_s26  ;;  %s802_s4 = sld [smem:[#allocation4 + $0x16]] }
  0x23   :  { %v69_v14 = vsub.f32 %v66_v12, %v68_v9  ;;  %v127_v27 = vstv %s787_s27  ;;  %v122_v33 = vmul.f32 %v121_v24, %v119_v23  ;;  %s807_s5 = sld [smem:[#allocation4 + $0x10]]  ;;  %v123_v41 = vmul.f32 %v121_v24, %v120_v32  ;;  %v247_v24 = vld [vmem:[#allocation5 + $0x30] sm:$0xff] }
  0x24   :  { %v132_v40 = vstv %s789_s28  ;;  %s810_s6 = sld [smem:[#allocation4 + $0x12]] }
  0x25   :  { %v71_v16 = vadd.f32 %v69_v14, %v58_v10  ;;  %v72_v17 = vadd.f32 %v69_v14, %v59_v11  ;;  %v137_v44 = vstv %s792_s29  ;;  %s814_s7 = sld [smem:[#allocation4 + $0x13]] }
  0x26   :  { %v142_v51 = vstv %s796_s30  ;;  %s817_s8 = sld [smem:[#allocation4 + $0x14]] }
  0x27   :  { %v76_v19 = vsub.f32 %v71_v16, %v74_v15  ;;  %v77_v20 = vsub.f32 %v72_v17, %v74_v15  ;;  %v188_v54 = vstv %s798_s3  ;;  %s823_s9 = sld [smem:[#allocation4 + $0x15]] }
  0x28   :  { %v177_v55 = vstv %s802_s4  ;;  %s825_s10 = sld [smem:[#allocation4 + $0x19]] }
  0x29   :  { %v79_v25 = vsub.f32 %v76_v19, %v78_v18  ;;  %v80_v26 = vsub.f32 %v77_v20, %v78_v18  ;;  %v125_v28 = vmul.f32 %v124_v21, %v76_v19  ;;  %v126_v29 = vmul.f32 %v124_v21, %v77_v20  ;;  %s829_s11 = sld [smem:[#allocation4 + $0x1e]] }
  0x2a   :  { %v114_v30 = vsub.f32 %v76_v19, %v113_v22  ;;  %v115_v31 = vsub.f32 %v77_v20, %v113_v22  ;;  %v185_v57 = vstv %s807_s5  ;;  %v191_v60 = vstv %s810_s6  ;;  %s834_s12 = sld [smem:[#allocation4 + $0x18]] }
  0x2b   :  { %vm81_vm1 = vcmp.gt.f32.partialorder %v79_v25, 0.0  ;;  %vm82_vm2 = vcmp.gt.f32.partialorder %v80_v26, 0.0  ;;  %v186_v2 = vmul.f32 %v185_v57, %v183_v56  ;;  %v196_v8 = vstv %s814_s7  ;;  %s837_s13 = sld [smem:[#allocation4 + $0x1a]] }
  0x2c   :  { %v571_v35 = vsel %vm81_vm1, 1.0, %v758_v34  ;;  %v572_v36 = vsel %vm82_vm2, 1.0, %v758_v34  ;;  %vm116_vm3 = vcmp.gt.f32.partialorder %v114_v30, 0.0  ;;  %vm117_vm4 = vcmp.gt.f32.partialorder %v115_v31, 0.0  ;;  %s841_s14 = sld [smem:[#allocation4 + $0x1b]] }
  0x2d   :  { %v669_v37 = vpack.c.bf16 %v572_v36, %v571_v35  ;;  %v128_v38 = vsel %vm116_vm3, %v127_v27, 1.0  ;;  %v129_v39 = vsel %vm117_vm4, %v127_v27, 1.0  ;;  %v138_v47 = vsel %vm116_vm3, %v137_v44, 0.0  ;;  %s844_s15 = sld [smem:[#allocation4 + $0x1c]] }
  0x2e   :  { %v130_v42 = vmul.f32 %v128_v38, %v125_v28  ;;  %v131_v43 = vmul.f32 %v129_v39, %v126_v29  ;;  %v139_v48 = vsel %vm117_vm4, %v137_v44, 0.0  ;;  %v187_v9 = vmul.f32 %v185_v57, %v184_v1  ;;  %s850_s16 = sld [smem:[#allocation4 + $0x1d]]  ;;  %v311_v57 = vld [vmem:[#allocation5 + $0x40] sm:$0xff] }
  0x2f   :  { %670 = vst [vmem:[#allocation8] sm:$0xff] %v669_v37   ;;  %v201_v12 = vstv %s817_s8  ;;  %v206_v19 = vstv %s823_s9  ;;  %v252_v22 = vstv %s825_s10  ;;  %v241_v23 = vstv %s829_s11  ;;  %s852_s17 = sld [smem:[#allocation4 + $0x21]] }
  0x30   :  { %v133_v45 = vsub.f32 %v130_v42, %v132_v40  ;;  %v134_v46 = vsub.f32 %v131_v43, %v132_v40  ;;  %v249_v25 = vstv %s834_s12  ;;  %s856_s18 = sld [smem:[#allocation4 + $0x26]] }
  0x31   :  { %v255_v28 = vstv %s837_s13  ;;  %v250_v35 = vmul.f32 %v249_v25, %v247_v24  ;;  %s861_s0 = sld [smem:[#allocation4 + $0x20]] }
  0x32   :  { %v135_v49 = vadd.f32 %v133_v45, %v122_v33  ;;  %v136_v50 = vadd.f32 %v134_v46, %v123_v41  ;;  %v248_v33 = vld [vmem:[#allocation5 + $0x38] sm:$0xff]  ;;  %v260_v41 = vstv %s841_s14  ;;  %s864_s19 = sld [smem:[#allocation4 + $0x22]] }
  0x33   :  { %v251_v42 = vmul.f32 %v249_v25, %v248_v33  ;;  %v265_v45 = vstv %s844_s15  ;;  %s868_s20 = sld [smem:[#allocation4 + $0x23]]  ;;  %v375_v33 = vld [vmem:[#allocation5 + $0x50] sm:$0xff]  ;;  %s759_s15 = smov [#allocation8]  }
  0x34   :  { %v140_v52 = vsub.f32 %v135_v49, %v138_v47  ;;  %v141_v53 = vsub.f32 %v136_v50, %v139_v48  ;;  %s871_s21 = sld [smem:[#allocation4 + $0x24]] }
  0x35   :  { %s877_s22 = sld [smem:[#allocation4 + $0x25]] }
  0x36   :  { %v143_v58 = vsub.f32 %v140_v52, %v142_v51  ;;  %v144_v59 = vsub.f32 %v141_v53, %v142_v51  ;;  %v189_v61 = vmul.f32 %v188_v54, %v140_v52  ;;  %v190_v62 = vmul.f32 %v188_v54, %v141_v53  ;;  %s879_s23 = sld [smem:[#allocation4 + $0x29]] }
  0x37   :  { %v178_v63 = vsub.f32 %v140_v52, %v177_v55  ;;  %v179_v0 = vsub.f32 %v141_v53, %v177_v55  ;;  %v270_v52 = vstv %s850_s16  ;;  %v316_v55 = vstv %s852_s17  ;;  %s883_s24 = sld [smem:[#allocation4 + $0x2e]]  ;;  %s553_s16 = sshll.u32 %s759_s15, 4  ;;  %s554_s16 = int_to_ptr.vmem [resolvable:$true] %s553_s16 }
  0x38   :  { %vm145_vm5 = vcmp.gt.f32.partialorder %v143_v58, 0.0  ;;  %vm146_vm6 = vcmp.gt.f32.partialorder %v144_v59, 0.0  ;;  %v305_v56 = vstv %s856_s18  ;;  %v313_v58 = vstv %s861_s0  ;;  %s888_s25 = sld [smem:[#allocation4 + $0x28]]  ;;  %s728_s17 = scalar_lea.vmem %s554_s16, 1024 }
  0x39   :  { %v582_v3 = vsel %vm145_vm5, 1.0, %v758_v34  ;;  %v583_v4 = vsel %vm146_vm6, 1.0, %v758_v34  ;;  %vm180_vm7 = vcmp.gt.f32.partialorder %v178_v63, 0.0  ;;  %vm181_vm8 = vcmp.gt.f32.partialorder %v179_v0, 0.0  ;;  %s891_s1 = sld [smem:[#allocation4 + $0x2a]]  ;;  %p729_p5 = scmp.ne.s32.totalorder %s554_s16, %s728_s17 }
  0x3a   :  { %v672_v5 = vpack.c.bf16 %v583_v4, %v582_v3  ;;  %v192_v6 = vsel %vm180_vm7, %v191_v60, 1.0  ;;  %v193_v7 = vsel %vm181_vm8, %v191_v60, 1.0  ;;  %v202_v15 = vsel %vm180_vm7, %v201_v12, 0.0  ;;  %s893_s26 = sld [smem:[#allocation4 + $0x2b]]  ;;  %p733_p6 = scmp.lt.s32.totalorder %s554_s16, %s554_s16 }
  0x3b   :  { %v194_v10 = vmul.f32 %v192_v6, %v189_v61  ;;  %v195_v11 = vmul.f32 %v193_v7, %v190_v62  ;;  %v203_v16 = vsel %vm181_vm8, %v201_v12, 0.0  ;;  %v319_v61 = vstv %s864_s19  ;;  %s898_s27 = sld [smem:[#allocation4 + $0x2c]]  ;;  %p734_p7 = scmp.lt.s32.totalorder %s728_s17, %s728_s17 }
  0x3c   :  { %673 = vst [vmem:[#allocation8 + $0x8] sm:$0xff] %v672_v5   ;;  %v314_v3 = vmul.f32 %v313_v58, %v311_v57  ;;  %s904_s28 = sld [smem:[#allocation4 + $0x2d]] }
  0x3d   :  { %v197_v13 = vsub.f32 %v194_v10, %v196_v8  ;;  %v198_v14 = vsub.f32 %v195_v11, %v196_v8  ;;  %v369_v24 = vstv %s883_s24  ;;  %s907_s29 = sld [smem:[#allocation4 + $0x31]]  ;;  %p735_p8 = por %p734_p7, %p733_p6 }
  0x3e   :  { %s911_s30 = sld [smem:[#allocation4 + $0x36]] }
  0x3f   :  { %v199_v17 = vadd.f32 %v197_v13, %v186_v2  ;;  %v200_v18 = vadd.f32 %v198_v14, %v187_v9  ;;  %v312_v2 = vld [vmem:[#allocation5 + $0x48] sm:$0xff]  ;;  %v324_v9 = vstv %s868_s20  ;;  %v329_v13 = vstv %s871_s21  ;;  %s915_s3 = sld [smem:[#allocation4 + $0x30]]  ;;  %p736_p9 = pnand %p735_p8, %p729_p5 }
  0x40   :  { %v315_v10 = vmul.f32 %v313_v58, %v312_v2  ;;  %s918_s4 = sld [smem:[#allocation4 + $0x32]]  ;;  %v439_v58 = vld [vmem:[#allocation5 + $0x60] sm:$0xff] }
  0x41   :  { %v204_v20 = vsub.f32 %v199_v17, %v202_v15  ;;  %v205_v21 = vsub.f32 %v200_v18, %v203_v16  ;;  %s922_s5 = sld [smem:[#allocation4 + $0x33]] }
  0x42   :  { %s925_s6 = sld [smem:[#allocation4 + $0x34]] }
  0x43   :  { %v207_v26 = vsub.f32 %v204_v20, %v206_v19  ;;  %v208_v27 = vsub.f32 %v205_v21, %v206_v19  ;;  %v253_v29 = vmul.f32 %v252_v22, %v204_v20  ;;  %v254_v30 = vmul.f32 %v252_v22, %v205_v21  ;;  %s930_s7 = sld [smem:[#allocation4 + $0x35]] }
  0x44   :  { %v242_v31 = vsub.f32 %v204_v20, %v241_v23  ;;  %v243_v32 = vsub.f32 %v205_v21, %v241_v23  ;;  %v334_v20 = vstv %s877_s22  ;;  %v380_v23 = vstv %s879_s23  ;;  %s933_s8 = sld [smem:[#allocation4 + $0x38]] }
  0x45   :  { %vm209_vm9 = vcmp.gt.f32.partialorder %v207_v26, 0.0  ;;  %vm210_vm10 = vcmp.gt.f32.partialorder %v208_v27, 0.0  ;;  %v377_v27 = vstv %s888_s25  ;;  %v433_v57 = vstv %s911_s30  ;;  %s935_s9 = sld [smem:[#allocation4 + $0x3e]] }
  0x46   :  { %v593_v36 = vsel %vm209_vm9, 1.0, %v758_v34  ;;  %v594_v37 = vsel %vm210_vm10, 1.0, %v758_v34  ;;  %vm244_vm11 = vcmp.gt.f32.partialorder %v242_v31, 0.0  ;;  %vm245_vm12 = vcmp.gt.f32.partialorder %v243_v32, 0.0  ;;  %s939_s10 = sld [smem:[#allocation4 + $0x39]] }
  0x47   :  { %v675_v38 = vpack.c.bf16 %v594_v37, %v593_v36  ;;  %v256_v39 = vsel %vm244_vm11, %v255_v28, 1.0  ;;  %v257_v40 = vsel %vm245_vm12, %v255_v28, 1.0  ;;  %v266_v48 = vsel %vm244_vm11, %v265_v45, 0.0  ;;  %s944_s11 = sld [smem:[#allocation4 + $0x3a]] }
  0x48   :  { %v258_v43 = vmul.f32 %v256_v39, %v253_v29  ;;  %v259_v44 = vmul.f32 %v257_v40, %v254_v30  ;;  %v267_v49 = vsel %vm245_vm12, %v265_v45, 0.0  ;;  %v383_v28 = vstv %s891_s1  ;;  %s947_s12 = sld [smem:[#allocation4 + $0x3b]] }
  0x49   :  { %676 = vst [vmem:[#allocation8 + $0x10] sm:$0xff] %v675_v38   ;;  %v388_v36 = vstv %s893_s26  ;;  %v378_v40 = vmul.f32 %v377_v27, %v375_v33  ;;  %s951_s13 = sld [smem:[#allocation4 + $0x3c]] }
  0x4a   :  { %v261_v46 = vsub.f32 %v258_v43, %v260_v41  ;;  %v262_v47 = vsub.f32 %v259_v44, %v260_v41  ;;  %s646_s14 = sld [smem:[#allocation4 + $0x3d]] }
  0x4c   :  { %v263_v50 = vadd.f32 %v261_v46, %v250_v35  ;;  %v264_v51 = vadd.f32 %v262_v47, %v251_v42  ;;  %v376_v35 = vld [vmem:[#allocation5 + $0x58] sm:$0xff]  ;;  %v393_v46 = vstv %s898_s27 }
  0x4d   :  { %v379_v43 = vmul.f32 %v377_v27, %v376_v35  ;;  %v504_v27 = vld [vmem:[#allocation5 + $0x78] sm:$0xff] }
  0x4e   :  { %v268_v53 = vsub.f32 %v263_v50, %v266_v48  ;;  %v269_v54 = vsub.f32 %v264_v51, %v267_v49 }
  0x50   :  { %v271_v59 = vsub.f32 %v268_v53, %v270_v52  ;;  %v272_v60 = vsub.f32 %v269_v54, %v270_v52  ;;  %v317_v62 = vmul.f32 %v316_v55, %v268_v53  ;;  %v318_v63 = vmul.f32 %v316_v55, %v269_v54 }
  0x51   :  { %v306_v0 = vsub.f32 %v268_v53, %v305_v56  ;;  %v307_v1 = vsub.f32 %v269_v54, %v305_v56  ;;  %v398_v53 = vstv %s904_s28  ;;  %v444_v56 = vstv %s907_s29 }
  0x52   :  { %vm273_vm13 = vcmp.gt.f32.partialorder %v271_v59, 0.0  ;;  %vm274_vm14 = vcmp.gt.f32.partialorder %v272_v60, 0.0  ;;  %v441_v59 = vstv %s915_s3 }
  0x53   :  { %v604_v4 = vsel %vm273_vm13, 1.0, %v758_v34  ;;  %v605_v5 = vsel %vm274_vm14, 1.0, %v758_v34  ;;  %vm308_vm15 = vcmp.gt.f32.partialorder %v306_v0, 0.0  ;;  %vm309_vm0 = vcmp.gt.f32.partialorder %v307_v1, 0.0 }
  0x54   :  { %v678_v6 = vpack.c.bf16 %v605_v5, %v604_v4  ;;  %v320_v7 = vsel %vm308_vm15, %v319_v61, 1.0  ;;  %v321_v8 = vsel %vm309_vm0, %v319_v61, 1.0  ;;  %v330_v16 = vsel %vm308_vm15, %v329_v13, 0.0 }
  0x55   :  { %v322_v11 = vmul.f32 %v320_v7, %v317_v62  ;;  %v323_v12 = vmul.f32 %v321_v8, %v318_v63  ;;  %v331_v17 = vsel %vm309_vm0, %v329_v13, 0.0  ;;  %v447_v62 = vstv %s918_s4 }
  0x56   :  { %679 = vst [vmem:[#allocation8 + $0x18] sm:$0xff] %v678_v6   ;;  %v442_v4 = vmul.f32 %v441_v59, %v439_v58 }
  0x57   :  { %v325_v14 = vsub.f32 %v322_v11, %v324_v9  ;;  %v326_v15 = vsub.f32 %v323_v12, %v324_v9 }
  0x59   :  { %v327_v18 = vadd.f32 %v325_v14, %v314_v3  ;;  %v328_v19 = vadd.f32 %v326_v15, %v315_v10  ;;  %v440_v3 = vld [vmem:[#allocation5 + $0x68] sm:$0xff]  ;;  %v452_v10 = vstv %s922_s5  ;;  %v457_v14 = vstv %s925_s6 }
  0x5a   :  { %v443_v11 = vmul.f32 %v441_v59, %v440_v3 }
  0x5b   :  { %v332_v21 = vsub.f32 %v327_v18, %v330_v16  ;;  %v333_v22 = vsub.f32 %v328_v19, %v331_v17 }
  0x5d   :  { %v335_v25 = vsub.f32 %v332_v21, %v334_v20  ;;  %v336_v26 = vsub.f32 %v333_v22, %v334_v20  ;;  %v381_v29 = vmul.f32 %v380_v23, %v332_v21  ;;  %v382_v30 = vmul.f32 %v380_v23, %v333_v22 }
  0x5e   :  { %v370_v31 = vsub.f32 %v332_v21, %v369_v24  ;;  %v371_v32 = vsub.f32 %v333_v22, %v369_v24  ;;  %v503_v21 = vld [vmem:[#allocation5 + $0x70] sm:$0xff]  ;;  %v505_v22 = vstv %s933_s8  ;;  %v462_v23 = vstv %s930_s7 }
  0x5f   :  { %vm337_vm1 = vcmp.gt.f32.partialorder %v335_v25, 0.0  ;;  %vm338_vm2 = vcmp.gt.f32.partialorder %v336_v26, 0.0  ;;  %v497_v24 = vstv %s935_s9 }
  0x60   :  { %v615_v37 = vsel %vm337_vm1, 1.0, %v758_v34  ;;  %v616_v38 = vsel %vm338_vm2, 1.0, %v758_v34  ;;  %vm372_vm3 = vcmp.gt.f32.partialorder %v370_v31, 0.0  ;;  %vm373_vm4 = vcmp.gt.f32.partialorder %v371_v32, 0.0 }
  0x61   :  { %v681_v39 = vpack.c.bf16 %v616_v38, %v615_v37  ;;  %v384_v41 = vsel %vm372_vm3, %v383_v28, 1.0  ;;  %v385_v42 = vsel %vm373_vm4, %v383_v28, 1.0  ;;  %v394_v49 = vsel %vm372_vm3, %v393_v46, 0.0 }
  0x62   :  { %v386_v44 = vmul.f32 %v384_v41, %v381_v29  ;;  %v387_v45 = vmul.f32 %v385_v42, %v382_v30  ;;  %v395_v50 = vsel %vm373_vm4, %v393_v46, 0.0  ;;  %v508_v28 = vstv %s939_s10 }
  0x63   :  { %682 = vst [vmem:[#allocation8 + $0x20] sm:$0xff] %v681_v39   ;;  %v506_v29 = vmul.f32 %v505_v22, %v503_v21  ;;  %v511_v30 = vstv %s944_s11  ;;  %v516_v39 = vstv %s947_s12 }
  0x64   :  { %v389_v47 = vsub.f32 %v386_v44, %v388_v36  ;;  %v390_v48 = vsub.f32 %v387_v45, %v388_v36  ;;  %v507_v36 = vmul.f32 %v505_v22, %v504_v27 }
  0x66   :  { %v391_v51 = vadd.f32 %v389_v47, %v378_v40  ;;  %v392_v52 = vadd.f32 %v390_v48, %v379_v43  ;;  %v521_v47 = vstv %s951_s13 }
  0x68   :  { %v396_v54 = vsub.f32 %v391_v51, %v394_v49  ;;  %v397_v55 = vsub.f32 %v392_v52, %v395_v50 }
  0x6a   :  { %v399_v60 = vsub.f32 %v396_v54, %v398_v53  ;;  %v400_v61 = vsub.f32 %v397_v55, %v398_v53  ;;  %v445_v63 = vmul.f32 %v444_v56, %v396_v54  ;;  %v446_v0 = vmul.f32 %v444_v56, %v397_v55 }
  0x6b   :  { %v434_v1 = vsub.f32 %v396_v54, %v433_v57  ;;  %v435_v2 = vsub.f32 %v397_v55, %v433_v57  ;;  %v526_v54 = vstv %s646_s14 }
  0x6c   :  { %vm401_vm5 = vcmp.gt.f32.partialorder %v399_v60, 0.0  ;;  %vm402_vm6 = vcmp.gt.f32.partialorder %v400_v61, 0.0 }
  0x6d   :  { %v626_v5 = vsel %vm401_vm5, 1.0, %v758_v34  ;;  %v627_v6 = vsel %vm402_vm6, 1.0, %v758_v34  ;;  %vm436_vm7 = vcmp.gt.f32.partialorder %v434_v1, 0.0  ;;  %vm437_vm8 = vcmp.gt.f32.partialorder %v435_v2, 0.0 }
  0x6e   :  { %v684_v7 = vpack.c.bf16 %v627_v6, %v626_v5  ;;  %v448_v8 = vsel %vm436_vm7, %v447_v62, 1.0  ;;  %v449_v9 = vsel %vm437_vm8, %v447_v62, 1.0  ;;  %v458_v17 = vsel %vm436_vm7, %v457_v14, 0.0 }
  0x6f   :  { %v450_v12 = vmul.f32 %v448_v8, %v445_v63  ;;  %v451_v13 = vmul.f32 %v449_v9, %v446_v0  ;;  %v459_v18 = vsel %vm437_vm8, %v457_v14, 0.0 }
  0x70   :  { %685 = vst [vmem:[#allocation8 + $0x28] sm:$0xff] %v684_v7  }
  0x71   :  { %v453_v15 = vsub.f32 %v450_v12, %v452_v10  ;;  %v454_v16 = vsub.f32 %v451_v13, %v452_v10 }
  0x73   :  { %v455_v19 = vadd.f32 %v453_v15, %v442_v4  ;;  %v456_v20 = vadd.f32 %v454_v16, %v443_v11 }
  0x75   :  { %v460_v25 = vsub.f32 %v455_v19, %v458_v17  ;;  %v461_v26 = vsub.f32 %v456_v20, %v459_v18 }
  0x77   :  { %v463_v31 = vsub.f32 %v460_v25, %v462_v23  ;;  %v464_v32 = vsub.f32 %v461_v26, %v462_v23  ;;  %v498_v33 = vsub.f32 %v460_v25, %v497_v24  ;;  %v499_v35 = vsub.f32 %v461_v26, %v497_v24 }
  0x78   :  { %v509_v37 = vmul.f32 %v508_v28, %v460_v25  ;;  %v510_v38 = vmul.f32 %v508_v28, %v461_v26 }
  0x79   :  { %vm465_vm9 = vcmp.gt.f32.partialorder %v463_v31, 0.0  ;;  %vm466_vm10 = vcmp.gt.f32.partialorder %v464_v32, 0.0  ;;  %vm500_vm11 = vcmp.gt.f32.partialorder %v498_v33, 0.0  ;;  %vm501_vm12 = vcmp.gt.f32.partialorder %v499_v35, 0.0 }
  0x7a   :  { %v637_v40 = vsel %vm465_vm9, 1.0, %v758_v34  ;;  %v638_v41 = vsel %vm466_vm10, 1.0, %v758_v34  ;;  %v512_v42 = vsel %vm500_vm11, %v511_v30, 1.0  ;;  %v513_v43 = vsel %vm501_vm12, %v511_v30, 1.0 }
  0x7b   :  { %v687_v44 = vpack.c.bf16 %v638_v41, %v637_v40  ;;  %v514_v45 = vmul.f32 %v512_v42, %v509_v37  ;;  %v515_v46 = vmul.f32 %v513_v43, %v510_v38  ;;  %v522_v50 = vsel %vm500_vm11, %v521_v47, 0.0 }
  0x7c   :  { %v523_v51 = vsel %vm501_vm12, %v521_v47, 0.0 }
  0x7d   :  { %688 = vst [vmem:[#allocation8 + $0x30] sm:$0xff] %v687_v44   ;;  %v517_v48 = vsub.f32 %v514_v45, %v516_v39  ;;  %v518_v49 = vsub.f32 %v515_v46, %v516_v39 }
  0x7f   :  { %v519_v52 = vadd.f32 %v517_v48, %v506_v29  ;;  %v520_v53 = vadd.f32 %v518_v49, %v507_v36 }
  0x81   :  { %v524_v55 = vsub.f32 %v519_v52, %v522_v50  ;;  %v525_v56 = vsub.f32 %v520_v53, %v523_v51 }
  0x83   :  { %v527_v57 = vsub.f32 %v524_v55, %v526_v54  ;;  %v528_v58 = vsub.f32 %v525_v56, %v526_v54 }
  0x85   :  { %vm529_vm13 = vcmp.gt.f32.partialorder %v527_v57, 0.0  ;;  %vm530_vm14 = vcmp.gt.f32.partialorder %v528_v58, 0.0 }
  0x86   :  { %v648_v59 = vsel %vm529_vm13, 1.0, %v758_v34  ;;  %v649_v60 = vsel %vm530_vm14, 1.0, %v758_v34 }
  0x87   :  { %v690_v61 = vpack.c.bf16 %v649_v60, %v648_v59 }
  0x89   :  { %691 = vst [vmem:[#allocation8 + $0x38] sm:$0xff] %v690_v61  }
  0x8a   :  { %739 = shalt.err (!%p736_p9)
}
  0x8b   :  { %s760_s18 = smov 64   ;;  %s761_s0 = smov 4  }
  0x8c   :  { %559 = dma.vmem_to_hbm [thread:$0]  %s554_s16, 1024, %s969_s2, [#allocation7], %s760_s18, %s760_s18, %s761_s0  }
  0x8d   :  { %752 = dma.done.wait [#allocation7], 1024  }
  0x8e   :  { %753 = vsyncadd [#allocation7], 4294966272 }
  0x8f   :  { %563 = vsyncpa [#allocation6], 1 }
  0x90   :  { %564 = vsyncpa [#allocation7], 1 }

</bundles_post_ra>
